<compile_context>
chip_gen: v5e
topology: v5e:2x2
jax: 0.10.0
libtpu: 0.0.40
codegen_flags: <defaults>
</compile_context>

<pallas_src>
import jax
import jax.numpy as jnp
from jax import lax
from jax.experimental import pallas as pl
from jax.experimental.pallas import tpu as pltpu


HIDDEN = 256
_W3_ROWS = 8  # fc3 weight stored as 8 replicated sublane rows (row 0 is used)


def _cdiv(a, b):
    return (a + b - 1) // b


def _round_up(a, b):
    return _cdiv(a, b) * b


def _choose_tiling(B, tile_cap):
    """Balanced batch tiling: pick n_tiles first, then a common TB (multiple of 8)."""
    tile_cap = max(8, _round_up(tile_cap, 8))
    n_tiles = max(1, _cdiv(B, tile_cap))
    if n_tiles == 1 and B > 8:
        n_tiles = 2                      # keep both v7x TensorCores busy
    TB = _round_up(_cdiv(B, n_tiles), 8)
    n_tiles = _cdiv(B, TB)               # re-derive after rounding (never drops below 2 for B > 8)
    return n_tiles, TB


def discriminator_kernel(x_ref, w1_ref, b1_ref, w2_ref, b2_ref, w3_ref, b3_ref,
                         o_ref):
    # fc1: bf16 MXU operands, f32 accumulation, f32 bias + ReLU on the VPU.
    x = x_ref[...].astype(jnp.bfloat16)
    h1 = jnp.dot(x, w1_ref[...], preferred_element_type=jnp.float32) + b1_ref[...]
    h1 = jnp.maximum(h1, 0.0)

    # fc2: same bf16-in / f32-acc pattern.
    h2 = jnp.dot(h1.astype(jnp.bfloat16), w2_ref[...],
                 preferred_element_type=jnp.float32) + b2_ref[...]
    h2 = jnp.maximum(h2, 0.0)

    # fc3 head (256 -> 1): tiny transposed-RHS matmul on the MXU, contracting the
    # hidden axis of both operands -> (8, TB).  Row 0 is the real fc3 row; the result
    # is naturally lane-dense (batch on lanes), so no XLU reduce / relayout is needed.
    head = lax.dot_general(w3_ref[...], h2.astype(jnp.bfloat16),
                           (((1,), (1,)), ((), ())),
                           preferred_element_type=jnp.float32)      # (8, TB) f32

    # Lane-dense (1, TB) output block.
    o_ref[...] = (head[0:1, :] + b3_ref[0]).astype(o_ref.dtype)


def discriminator_forward(x, params, *, tile_b=2048):
    """x: (B, num_particles) f32 (or bf16). Returns (B, 1) f32.

    tile_b=2048 is safe under v5e's default scoped VMEM; 4096 also fits on v6e/v7x
    with the 32 MiB vmem limit set below.
    """
    w1, b1, w2, b2, w3, b3 = params
    B, K = x.shape
    H = w1.shape[1]

    n_tiles, TB = _choose_tiling(B, tile_b)
    B_pad = n_tiles * TB
    if B_pad != B:
        x = jnp.pad(x, ((0, B_pad - B), (0, 0)))

    const2 = lambda i: (0, 0)  # weights / biases resident across grid steps

    flops = 2 * B_pad * (K * H + H * H + _W3_ROWS * H)
    bytes_accessed = int(
        B_pad * K * x.dtype.itemsize            # activation stream in
        + B_pad * 4                             # output slab
        + w1.size * w1.dtype.itemsize + w2.size * w2.dtype.itemsize
        + w3.size * w3.dtype.itemsize
        + b1.size * 4 + b2.size * 4 + b3.size * 4)

    out = pl.pallas_call(
        discriminator_kernel,
        out_shape=jax.ShapeDtypeStruct((n_tiles, TB), jnp.float32),
        grid_spec=pltpu.PrefetchScalarGridSpec(
            num_scalar_prefetch=0,
            grid=(n_tiles,),
            in_specs=[
                pl.BlockSpec((TB, K), lambda i: (i, 0)),        # x tile (batch-tiled)
                pl.BlockSpec((K, H), const2),                   # w1 (bf16)
                pl.BlockSpec((1, H), const2),                   # b1 (f32)
                pl.BlockSpec((H, H), const2),                   # w2 (bf16)
                pl.BlockSpec((1, H), const2),                   # b2 (f32)
                pl.BlockSpec((_W3_ROWS, H), const2),            # w3 rows (bf16)
                pl.BlockSpec((1,), lambda i: (0,),              # b3 scalar in SMEM
                             memory_space=pltpu.MemorySpace.SMEM),
            ],
            out_specs=pl.BlockSpec((1, TB), lambda i: (i, 0)),  # lane-dense output row
        ),
        compiler_params=pltpu.CompilerParams(
            dimension_semantics=("parallel",),
            vmem_limit_bytes=32 * 1024 * 1024),
        cost_estimate=pl.CostEstimate(
            flops=flops, transcendentals=0, bytes_accessed=bytes_accessed),
    )(x, w1, b1, w2, b2, w3, b3)

    # (n_tiles, TB) lane-dense slab -> (B, 1)
    return out.reshape(-1)[:B].reshape(B, 1)


def init_params(key, num_particles, hidden=HIDDEN):
    # Deterministic synthetic init (Kaiming-uniform-like bounds, same shapes as
    # nn.Linear).  Weights in (in, out) layout; MXU operands stored in bf16.
    # fc3 weight is stored as 8 replicated (1, hidden) rows so the head matmul has a
    # sublane-aligned LHS; the kernel reads row 0.
    k1, k2, k3, k4, k5, k6 = jax.random.split(key, 6)

    def uniform(k, shape, fan_in):
        bound = 1.0 / jnp.sqrt(jnp.float32(fan_in))
        return jax.random.uniform(k, shape, jnp.float32, -bound, bound)

    w1 = uniform(k1, (num_particles, hidden), num_particles).astype(jnp.bfloat16)
    b1 = uniform(k2, (1, hidden), num_particles)
    w2 = uniform(k3, (hidden, hidden), hidden).astype(jnp.bfloat16)
    b2 = uniform(k4, (1, hidden), hidden)
    w3_row = uniform(k5, (1, hidden), hidden).astype(jnp.bfloat16)
    w3 = jnp.tile(w3_row, (_W3_ROWS, 1))          # replicated rows; row 0 used
    b3 = uniform(k6, (1,), hidden)                 # scalar bias (f32)
    return (w1, b1, w2, b2, w3, b3)


def reference_forward(x, params):
    # Mirrors the kernel's numerics exactly (bf16 MXU operands, f32 accumulation).
    w1, b1, w2, b2, w3, b3 = params
    h1 = jnp.maximum(
        jnp.dot(x.astype(jnp.bfloat16), w1, preferred_element_type=jnp.float32) + b1,
        0.0)
    h2 = jnp.maximum(
        jnp.dot(h1.astype(jnp.bfloat16), w2, preferred_element_type=jnp.float32) + b2,
        0.0)
    head = lax.dot_general(h2.astype(jnp.bfloat16), w3[0:1],
                           (((1,), (1,)), ((), ())),
                           preferred_element_type=jnp.float32)   # (B, 1)
    return head + b3[0]


if __name__ == "__main__":
    num_particles = 32   # "num_inputs" of the Discriminator

    key = jax.random.PRNGKey(0)
    kx, kp, kx2, kx3 = jax.random.split(key, 4)
    params = init_params(kp, num_particles)

    # Case 1: tiny batch (matches original usage), single grid step.
    x_small = jax.random.normal(kx, (8, num_particles), jnp.float32)
    out_small = jax.block_until_ready(discriminator_forward(x_small, params))
    ref_small = reference_forward(x_small, params)
    assert out_small.shape == (8, 1)
    assert jnp.allclose(out_small, ref_small, atol=1e-3, rtol=1e-3)

    # Case 2: non-multiple batch with a small tile cap -> 3 balanced tiles (TB=104),
    # exercises resident weights, padded tail rows and the lane-dense out slab.
    x_big = jax.random.normal(kx2, (300, num_particles), jnp.float32)
    out_big = jax.block_until_ready(
        discriminator_forward(x_big, params, tile_b=128))
    ref_big = reference_forward(x_big, params)
    assert out_big.shape == (300, 1)
    assert jnp.allclose(out_big, ref_big, atol=1e-3, rtol=1e-3)

    # Case 3: default tile cap with a mid-sized batch -> forced 2 balanced tiles
    # (keeps both v7x TensorCores busy; harmless single-core loop on v5e/v6e).
    x_mid = jax.random.normal(kx3, (1000, num_particles), jnp.float32)
    out_mid = jax.block_until_ready(discriminator_forward(x_mid, params))
    ref_mid = reference_forward(x_mid, params)
    assert out_mid.shape == (1000, 1)
    assert jnp.allclose(out_mid, ref_mid, atol=1e-3, rtol=1e-3)

    print("KERNEL_OK")
</pallas_src>

<mosaic_0001>
module attributes {stable_mosaic.version = 11 : i64} {
  func.func @discriminator_kernel(%arg0: i32, %arg1: memref<8x32xf32, #tpu.memory_space<vmem>>, %arg2: memref<32x256xbf16, #tpu.memory_space<vmem>>, %arg3: memref<1x256xf32, #tpu.memory_space<vmem>>, %arg4: memref<256x256xbf16, #tpu.memory_space<vmem>>, %arg5: memref<1x256xf32, #tpu.memory_space<vmem>>, %arg6: memref<8x256xbf16, #tpu.memory_space<vmem>>, %arg7: memref<1xf32, #tpu.memory_space<smem>>, %arg8: memref<1x8xf32, #tpu.memory_space<vmem>>) attributes {dimension_semantics = [#tpu.dimension_semantics<parallel>], iteration_bounds = array<i64: 1>, scalar_prefetch = 0 : i64, scratch_operands = 0 : i64, tpu.core_type = #tpu.core_type<tc>, window_params = [{transform_indices = @transform_0, window_bounds = array<i64: 8, 32>}, {pipeline_mode = #tpu.pipeline_mode<synchronous>, transform_indices = @transform_1, window_bounds = array<i64: 32, 256>}, {pipeline_mode = #tpu.pipeline_mode<synchronous>, transform_indices = @transform_2, window_bounds = array<i64: 1, 256>}, {pipeline_mode = #tpu.pipeline_mode<synchronous>, transform_indices = @transform_3, window_bounds = array<i64: 256, 256>}, {pipeline_mode = #tpu.pipeline_mode<synchronous>, transform_indices = @transform_4, window_bounds = array<i64: 1, 256>}, {pipeline_mode = #tpu.pipeline_mode<synchronous>, transform_indices = @transform_5, window_bounds = array<i64: 8, 256>}, {transform_indices = @transform_6, window_bounds = array<i64: 1>}, {transform_indices = @transform_7, window_bounds = array<i64: 1, 8>}]} {
    %c0 = arith.constant 0 : index
    %c0_0 = arith.constant 0 : index
    %0 = vector.load %arg1[%c0, %c0_0] : memref<8x32xf32, #tpu.memory_space<vmem>>, vector<8x32xf32>
    %1 = arith.truncf %0 : vector<8x32xf32> to vector<8x32xbf16>
    %c0_1 = arith.constant 0 : index
    %c0_2 = arith.constant 0 : index
    %2 = vector.load %arg2[%c0_1, %c0_2] : memref<32x256xbf16, #tpu.memory_space<vmem>>, vector<32x256xbf16>
    %cst = arith.constant dense<0.000000e+00> : vector<8x256xf32>
    %3 = tpu.matmul %1, %2, %cst {dimension_numbers = #tpu.dot_dimension_numbers<[1], [0], [0], [1], [0, 0, 1, 1], [], []>} : vector<8x32xbf16>, vector<32x256xbf16>, vector<8x256xf32> -> vector<8x256xf32>
    %c0_3 = arith.constant 0 : index
    %c0_4 = arith.constant 0 : index
    %4 = vector.load %arg3[%c0_3, %c0_4] : memref<1x256xf32, #tpu.memory_space<vmem>>, vector<1x256xf32>
    %5 = vector.broadcast %4 : vector<1x256xf32> to vector<8x256xf32>
    %6 = arith.addf %3, %5 : vector<8x256xf32>
    %cst_5 = arith.constant 0.000000e+00 : f32
    %7 = vector.broadcast %cst_5 : f32 to vector<8x256xf32>
    %8 = arith.maximumf %6, %7 : vector<8x256xf32>
    %9 = arith.truncf %8 : vector<8x256xf32> to vector<8x256xbf16>
    %c0_6 = arith.constant 0 : index
    %c0_7 = arith.constant 0 : index
    %10 = vector.load %arg4[%c0_6, %c0_7] : memref<256x256xbf16, #tpu.memory_space<vmem>>, vector<256x256xbf16>
    %cst_8 = arith.constant dense<0.000000e+00> : vector<8x256xf32>
    %11 = tpu.matmul %9, %10, %cst_8 {dimension_numbers = #tpu.dot_dimension_numbers<[1], [0], [0], [1], [0, 0, 1, 1], [], []>} : vector<8x256xbf16>, vector<256x256xbf16>, vector<8x256xf32> -> vector<8x256xf32>
    %c0_9 = arith.constant 0 : index
    %c0_10 = arith.constant 0 : index
    %12 = vector.load %arg5[%c0_9, %c0_10] : memref<1x256xf32, #tpu.memory_space<vmem>>, vector<1x256xf32>
    %13 = vector.broadcast %12 : vector<1x256xf32> to vector<8x256xf32>
    %14 = arith.addf %11, %13 : vector<8x256xf32>
    %cst_11 = arith.constant 0.000000e+00 : f32
    %15 = vector.broadcast %cst_11 : f32 to vector<8x256xf32>
    %16 = arith.maximumf %14, %15 : vector<8x256xf32>
    %c0_12 = arith.constant 0 : index
    %c0_13 = arith.constant 0 : index
    %17 = vector.load %arg6[%c0_12, %c0_13] : memref<8x256xbf16, #tpu.memory_space<vmem>>, vector<8x256xbf16>
    %18 = arith.truncf %16 : vector<8x256xf32> to vector<8x256xbf16>
    %cst_14 = arith.constant dense<0.000000e+00> : vector<8x8xf32>
    %19 = tpu.matmul %17, %18, %cst_14 {dimension_numbers = #tpu.dot_dimension_numbers<[1], [1], [0], [0], [0, 0, 1, 0], [], []>} : vector<8x256xbf16>, vector<8x256xbf16>, vector<8x8xf32> -> vector<8x8xf32>
    %20 = vector.extract_strided_slice %19 {offsets = [0, 0], sizes = [1, 8], strides = [1, 1]} : vector<8x8xf32> to vector<1x8xf32>
    %c0_15 = arith.constant 0 : index
    %21 = memref.load %arg7[%c0_15] : memref<1xf32, #tpu.memory_space<smem>>
    %22 = vector.broadcast %21 : f32 to vector<1x8xf32>
    %23 = arith.addf %20, %22 : vector<1x8xf32>
    %c0_16 = arith.constant 0 : index
    %c0_17 = arith.constant 0 : index
    %24 = vector.load %arg8[%c0_16, %c0_17] : memref<1x8xf32, #tpu.memory_space<vmem>>, vector<1x8xf32>
    tpu.vector_store %arg8[%c0_16, %c0_17], %23 {strides = array<i32>} : memref<1x8xf32, #tpu.memory_space<vmem>>, vector<1x8xf32>,
    return
  }
  func.func @transform_0(%arg0: i32) -> (i32, i32) {
    %c0_i32 = arith.constant 0 : i32
    %c0_i32_0 = arith.constant 0 : i32
    return %arg0, %c0_i32 : i32, i32
  }
  func.func @transform_1(%arg0: i32) -> (i32, i32) {
    %c0_i32 = arith.constant 0 : i32
    %c0_i32_0 = arith.constant 0 : i32
    %c0_i32_1 = arith.constant 0 : i32
    return %c0_i32, %c0_i32_0 : i32, i32
  }
  func.func @transform_2(%arg0: i32) -> (i32, i32) {
    %c0_i32 = arith.constant 0 : i32
    %c0_i32_0 = arith.constant 0 : i32
    %c0_i32_1 = arith.constant 0 : i32
    return %c0_i32, %c0_i32_0 : i32, i32
  }
  func.func @transform_3(%arg0: i32) -> (i32, i32) {
    %c0_i32 = arith.constant 0 : i32
    %c0_i32_0 = arith.constant 0 : i32
    %c0_i32_1 = arith.constant 0 : i32
    return %c0_i32, %c0_i32_0 : i32, i32
  }
  func.func @transform_4(%arg0: i32) -> (i32, i32) {
    %c0_i32 = arith.constant 0 : i32
    %c0_i32_0 = arith.constant 0 : i32
    %c0_i32_1 = arith.constant 0 : i32
    return %c0_i32, %c0_i32_0 : i32, i32
  }
  func.func @transform_5(%arg0: i32) -> (i32, i32) {
    %c0_i32 = arith.constant 0 : i32
    %c0_i32_0 = arith.constant 0 : i32
    %c0_i32_1 = arith.constant 0 : i32
    return %c0_i32, %c0_i32_0 : i32, i32
  }
  func.func @transform_6(%arg0: i32) -> i32 {
    %c0_i32 = arith.constant 0 : i32
    %c0_i32_0 = arith.constant 0 : i32
    return %c0_i32 : i32
  }
  func.func @transform_7(%arg0: i32) -> (i32, i32) {
    %c0_i32 = arith.constant 0 : i32
    %c0_i32_0 = arith.constant 0 : i32
    return %arg0, %c0_i32 : i32, i32
  }
}

</mosaic_0001>

<bundles_post_ra>
// kernel: tpu_custom_call.1
= control target key start
LH: loop header
LB: loop body
LE: loop exit
PB: predicated region body
PF: predicated region fallthrough
CT: control target
= control target key end

     0   :  { %13 = vsyncpa [#allocation4], 0  ;;  %s856_s0 = inlined_call_operand.hbm [shape: f32[8,32], index: 0, kind: input, shape index: {}]   ;;  %s857_s1 = inlined_call_operand.hbm [shape: bf16[32,256], index: 1, kind: input, shape index: {}]   ;;  %s858_s2 = inlined_call_operand.vmem [shape: f32[1,256], index: 2, kind: input, shape index: {}]   ;;  %s859_s3 = inlined_call_operand.hbm [shape: bf16[256,256], index: 3, kind: input, shape index: {}]   ;;  %s860_s4 = inlined_call_operand.vmem [shape: f32[1,256], index: 4, kind: input, shape index: {}]   ;;  %s861_s5 = inlined_call_operand.hbm [shape: bf16[8,256], index: 5, kind: input, shape index: {}]   ;;  %s862_s6 = inlined_call_operand.<no memory space> [shape: f32[1], index: 6, kind: input, shape index: {}]   ;;  %s863_s7 = inlined_call_operand.hbm [shape: f32[1,8], index: 7, kind: output, shape index: {}]  }
   0x1   :  { %14 = vsyncpa [#allocation7], 0 }
   0x2   :  { %15 = vsyncpa [#allocation10], 0  ;;  %s32_s26 = sshll.u32 %s857_s1, 4  ;;  %s33_s26 = int_to_ptr.hbm [resolvable:$true] %s32_s26 }
   0x3   :  { %16 = vsyncpa [#allocation5], 0  ;;  %s783_s27 = smov [#allocation6]   ;;  %s22_s8 = sshll.u32 %s856_s0, 4  ;;  %s23_s8 = int_to_ptr.hbm [resolvable:$true] %s22_s8 }
   0x4   :  { %s34_s28 = sshll.u32 %s783_s27, 4  ;;  %s784_s9 = smov 128   ;;  %s35_s28 = int_to_ptr.vmem [resolvable:$true] %s34_s28 }
   0x5   :  { %s785_s10 = smov 8   ;;  %s786_s11 = smov [#allocation3]  }
   0x6   :  { %40 = dma.hbm_to_vmem [thread:$0]  %s33_s26, 512, %s35_s28, [#allocation7], %s784_s9, %s784_s9, %s785_s10  }
   0x7   :  { %s24_s12 = sshll.u32 %s786_s11, 4  ;;  %s47_s15 = sshll.u32 %s859_s3, 4  ;;  %s25_s12 = int_to_ptr.vmem [resolvable:$true] %s24_s12  ;;  %s48_s15 = int_to_ptr.hbm [resolvable:$true] %s47_s15 }
   0x8   :  { %27 = dma.hbm_to_vmem [thread:$0]  %s23_s8, 128, %s25_s12, [#allocation4]  }
   0x9   :  { %s63_s17 = sshll.u32 %s861_s5, 4  ;;  %s787_s18 = smov [#allocation8]   ;;  %s64_s17 = int_to_ptr.hbm [resolvable:$true] %s63_s17 }
   0xa   :  { %s49_s19 = sshll.u32 %s787_s18, 4  ;;  %s788_s0 = smov [#allocation9]   ;;  %s50_s19 = int_to_ptr.vmem [resolvable:$true] %s49_s19 }
   0xb   :  { %55 = dma.hbm_to_vmem [thread:$0]  %s48_s15, 4096, %s50_s19, [#allocation7], %s784_s9, %s784_s9, %s785_s10  }
   0xc   :  { %s65_s20 = sshll.u32 %s788_s0, 4  ;;  %s66_s20 = int_to_ptr.vmem [resolvable:$true] %s65_s20 }
   0xd   :  { %68 = dma.hbm_to_vmem [thread:$0]  %s64_s17, 128, %s66_s20, [#allocation10]  }
   0xe   :  { %775 = dma.done.wait [#allocation4], 128  }
   0xf   :  { %776 = vsyncadd [#allocation4], 4294967168 }
  0x10   :  { %777 = dma.done.wait [#allocation7], 4608  }
  0x11   :  { %778 = vsyncadd [#allocation7], 4294962688 }
  0x12   :  { %779 = dma.done.wait [#allocation10], 128  }
  0x13   :  { %780 = vsyncadd [#allocation10], 4294967168  ;;  %v476_v0 = vld [vmem:[#allocation6 + $0x10] sm:$0xf]  ;;  %v615_v1 = vld [vmem:[#allocation6 + $0x14] sm:$0xf0] }
  0x14   :  { %v614_v2 = vld [vmem:[#allocation6 + $0x14] sm:$0xf]  ;;  %v477_v3 = vor.u32 %v615_v1, %v476_v0  ;;  %v478_v4 = vld [vmem:[#allocation6 + $0x18] sm:$0xf0]  ;;  %v468_v5 = vld [vmem:[#allocation6] sm:$0xf] }
  0x15   :  { %v613_v6 = vld [vmem:[#allocation6 + $0x4] sm:$0xf0]  ;;  %v481_v7 = vor.u32 %v614_v2, %v478_v4  ;;  %v612_v8 = vld [vmem:[#allocation6 + $0x4] sm:$0xf]  ;;  %v470_v9 = vld [vmem:[#allocation6 + $0x8] sm:$0xf0] }
  0x16   :  { %v88_v10 = vld [vmem:[#allocation3] sm:$0xff]  ;;  %vm120_vm0 = vcmask 261120   ;;  %130 = vmatpush.bf16.msra.mxu0 %v477_v3  ;;  %v469_v11 = vor.u32 %v613_v6, %v468_v5  ;;  %v542_v12 = vld [vmem:[#allocation8 + $0x70] sm:$0xf]  ;;  %v473_v15 = vor.u32 %v612_v8, %v470_v9  ;;  %v630_v18 = vld [vmem:[#allocation8 + $0x74] sm:$0xf] }
  0x17   :  { %v631_v13 = vld [vmem:[#allocation8 + $0x74] sm:$0xf0]  ;;  %v606_v14 = vld [vmem:[#allocation8 + $0xf0] sm:$0xf]  ;;  %143 = vmatpush.bf16.msra.mxu1 %v481_v7  ;;  %v544_v19 = vld [vmem:[#allocation8 + $0x78] sm:$0xf0]  ;;  %v89_v25 = vpack.c.bf16 %v88_v10, %v88_v10 }
  0x18   :  { %v543_v16 = vor.u32 %v631_v13, %v542_v12  ;;  %v647_v17 = vld [vmem:[#allocation8 + $0xf4] sm:$0xf0]  ;;  %v547_v21 = vor.u32 %v630_v18, %v544_v19  ;;  %v646_v22 = vld [vmem:[#allocation8 + $0xf4] sm:$0xf]  ;;  %v608_v23 = vld [vmem:[#allocation8 + $0xf8] sm:$0xf0] }
  0x19   :  { %v607_v20 = vor.u32 %v647_v17, %v606_v14  ;;  %v534_v24 = vld [vmem:[#allocation8 + $0x60] sm:$0xf]  ;;  %v611_v26 = vor.u32 %v646_v22, %v608_v23  ;;  %v629_v27 = vld [vmem:[#allocation8 + $0x64] sm:$0xf0]  ;;  %v628_v32 = vld [vmem:[#allocation8 + $0x64] sm:$0xf] }
  0x1a   :  { %352 = vmatpush.bf16.msra.mxu2 %v543_v16  ;;  %v598_v28 = vld [vmem:[#allocation8 + $0xe0] sm:$0xf]  ;;  %v645_v29 = vld [vmem:[#allocation8 + $0xe4] sm:$0xf0]  ;;  %131 = vmatpush.bf16.msra.mxu0 %v469_v11  ;;  %v535_v30 = vor.u32 %v629_v27, %v534_v24  ;;  %v536_v33 = vld [vmem:[#allocation8 + $0x68] sm:$0xf0] }
  0x1b   :  { %365 = vmatpush.bf16.msra.mxu3 %v607_v20  ;;  %v599_v31 = vor.u32 %v645_v29, %v598_v28  ;;  %v644_v34 = vld [vmem:[#allocation8 + $0xe4] sm:$0xf]  ;;  %144 = vmatpush.bf16.msra.mxu1 %v473_v15  ;;  %v539_v35 = vor.u32 %v628_v32, %v536_v33  ;;  %v600_v36 = vld [vmem:[#allocation8 + $0xe8] sm:$0xf0]  ;;  %v526_v37 = vld [vmem:[#allocation8 + $0x50] sm:$0xf] }
  0x1c   :  { %v627_v38 = vld [vmem:[#allocation8 + $0x54] sm:$0xf0]  ;;  %v603_v39 = vor.u32 %v644_v34, %v600_v36  ;;  %v590_v40 = vld [vmem:[#allocation8 + $0xd0] sm:$0xf]  ;;  %v626_v42 = vld [vmem:[#allocation8 + $0x54] sm:$0xf] }
  0x1d   :  { %v643_v41 = vld [vmem:[#allocation8 + $0xd4] sm:$0xf0]  ;;  %482 = vmatmul.msk.bf16.vlgmr.msra.gmra.mxu0 %vm120_vm0, %v89_v25  ;;  %v527_v43 = vor.u32 %v627_v38, %v526_v37  ;;  %v528_v44 = vld [vmem:[#allocation8 + $0x58] sm:$0xf0]  ;;  %v642_v45 = vld [vmem:[#allocation8 + $0xd4] sm:$0xf] }
  0x1e   :  { %378 = vmatpush.bf16.msrb.mxu0 %v547_v21  ;;  %353 = vmatpush.bf16.msra.mxu2 %v535_v30  ;;  %v592_v46 = vld [vmem:[#allocation8 + $0xd8] sm:$0xf0]  ;;  %v591_v47 = vor.u32 %v643_v41, %v590_v40  ;;  %v518_v48 = vld [vmem:[#allocation8 + $0x40] sm:$0xf]  ;;  %v625_v49 = vld [vmem:[#allocation8 + $0x44] sm:$0xf0]  ;;  %v531_v50 = vor.u32 %v626_v42, %v528_v44 }
  0x1f   :  { %391 = vmatpush.bf16.msrb.mxu1 %v611_v26  ;;  %366 = vmatpush.bf16.msra.mxu3 %v599_v31  ;;  %v582_v51 = vld [vmem:[#allocation8 + $0xc0] sm:$0xf]  ;;  %v641_v52 = vld [vmem:[#allocation8 + $0xc4] sm:$0xf0]  ;;  %v595_v53 = vor.u32 %v642_v45, %v592_v46  ;;  %v624_v54 = vld [vmem:[#allocation8 + $0x44] sm:$0xf]  ;;  %v519_v56 = vor.u32 %v625_v49, %v518_v48 }
  0x20   :  { %483 = vmatmul.msk.bf16.vlgmr.msra.gmra.mxu1 %vm120_vm0, %v89_v25  ;;  %v520_v55 = vld [vmem:[#allocation8 + $0x48] sm:$0xf0]  ;;  %v640_v57 = vld [vmem:[#allocation8 + $0xc4] sm:$0xf]  ;;  %v583_v59 = vor.u32 %v641_v52, %v582_v51  ;;  %v510_v60 = vld [vmem:[#allocation8 + $0x30] sm:$0xf] }
  0x21   :  { %v584_v58 = vld [vmem:[#allocation8 + $0xc8] sm:$0xf0]  ;;  %v623_v61 = vld [vmem:[#allocation8 + $0x34] sm:$0xf0]  ;;  %v523_v62 = vor.u32 %v624_v54, %v520_v55  ;;  %v574_v63 = vld [vmem:[#allocation8 + $0xb0] sm:$0xf] }
  0x22   :  { %379 = vmatpush.bf16.msrb.mxu0 %v539_v35  ;;  %354 = vmatpush.bf16.msra.mxu2 %v527_v43  ;;  %v639_v0 = vld [vmem:[#allocation8 + $0xb4] sm:$0xf0]  ;;  %v587_v1 = vor.u32 %v640_v57, %v584_v58  ;;  %v622_v2 = vld [vmem:[#allocation8 + $0x34] sm:$0xf]  ;;  %v512_v3 = vld [vmem:[#allocation8 + $0x38] sm:$0xf0]  ;;  %v511_v4 = vor.u32 %v623_v61, %v510_v60 }
  0x23   :  { %392 = vmatpush.bf16.msrb.mxu1 %v603_v39  ;;  %367 = vmatpush.bf16.msra.mxu3 %v591_v47  ;;  %v638_v5 = vld [vmem:[#allocation8 + $0xb4] sm:$0xf]  ;;  %v576_v6 = vld [vmem:[#allocation8 + $0xb8] sm:$0xf0]  ;;  %v575_v7 = vor.u32 %v639_v0, %v574_v63  ;;  %v502_v8 = vld [vmem:[#allocation8 + $0x20] sm:$0xf]  ;;  %v515_v10 = vor.u32 %v622_v2, %v512_v3 }
  0x24   :  { %v621_v9 = vld [vmem:[#allocation8 + $0x24] sm:$0xf0]  ;;  %v566_v11 = vld [vmem:[#allocation8 + $0xa0] sm:$0xf]  ;;  %v579_v13 = vor.u32 %v638_v5, %v576_v6  ;;  %v620_v14 = vld [vmem:[#allocation8 + $0x24] sm:$0xf] }
  0x25   :  { %v637_v12 = vld [vmem:[#allocation8 + $0xa4] sm:$0xf0]  ;;  %v504_v15 = vld [vmem:[#allocation8 + $0x28] sm:$0xf0]  ;;  %v503_v16 = vor.u32 %v621_v9, %v502_v8  ;;  %v636_v17 = vld [vmem:[#allocation8 + $0xa4] sm:$0xf] }
  0x26   :  { %380 = vmatpush.bf16.msrb.mxu0 %v531_v50  ;;  %355 = vmatpush.bf16.msra.mxu2 %v519_v56  ;;  %v568_v18 = vld [vmem:[#allocation8 + $0xa8] sm:$0xf0]  ;;  %v567_v19 = vor.u32 %v637_v12, %v566_v11  ;;  %v507_v20 = vor.u32 %v620_v14, %v504_v15  ;;  %v494_v22 = vld [vmem:[#allocation8 + $0x10] sm:$0xf]  ;;  %v619_v23 = vld [vmem:[#allocation8 + $0x14] sm:$0xf0] }
  0x27   :  { %393 = vmatpush.bf16.msrb.mxu1 %v595_v53  ;;  %368 = vmatpush.bf16.msra.mxu3 %v583_v59  ;;  %v571_v21 = vor.u32 %v636_v17, %v568_v18  ;;  %v558_v24 = vld [vmem:[#allocation8 + $0x90] sm:$0xf]  ;;  %v495_v25 = vor.u32 %v619_v23, %v494_v22  ;;  %v635_v26 = vld [vmem:[#allocation8 + $0x94] sm:$0xf0]  ;;  %v618_v27 = vld [vmem:[#allocation8 + $0x14] sm:$0xf] }
  0x28   :  { %v496_v28 = vld [vmem:[#allocation8 + $0x18] sm:$0xf0]  ;;  %v559_v29 = vor.u32 %v635_v26, %v558_v24  ;;  %v634_v31 = vld [vmem:[#allocation8 + $0x94] sm:$0xf]  ;;  %v486_v34 = vld [vmem:[#allocation8] sm:$0xf] }
  0x29   :  { %v499_v30 = vor.u32 %v618_v27, %v496_v28  ;;  %v560_v32 = vld [vmem:[#allocation8 + $0x98] sm:$0xf0]  ;;  %v617_v35 = vld [vmem:[#allocation8 + $0x4] sm:$0xf0]  ;;  %v550_v36 = vld [vmem:[#allocation8 + $0x80] sm:$0xf] }
  0x2a   :  { %381 = vmatpush.bf16.msrb.mxu0 %v523_v62  ;;  %356 = vmatpush.bf16.msra.mxu2 %v511_v4  ;;  %v563_v33 = vor.u32 %v634_v31, %v560_v32  ;;  %v487_v37 = vor.u32 %v617_v35, %v486_v34  ;;  %v633_v38 = vld [vmem:[#allocation8 + $0x84] sm:$0xf0]  ;;  %v616_v39 = vld [vmem:[#allocation8 + $0x4] sm:$0xf]  ;;  %v488_v40 = vld [vmem:[#allocation8 + $0x8] sm:$0xf0] }
  0x2b   :  { %394 = vmatpush.bf16.msrb.mxu1 %v587_v1  ;;  %369 = vmatpush.bf16.msra.mxu3 %v575_v7  ;;  %v551_v41 = vor.u32 %v633_v38, %v550_v36  ;;  %v491_v42 = vor.u32 %v616_v39, %v488_v40  ;;  %v632_v43 = vld [vmem:[#allocation8 + $0x84] sm:$0xf]  ;;  %v552_v44 = vld [vmem:[#allocation8 + $0x88] sm:$0xf0]  ;;  %v94_v46 = vld [vmem:[%s858_s2] sm:$0x3] }
  0x2c   :  { %v555_v45 = vor.u32 %v632_v43, %v552_v44  ;;  %v96_v47 = vperm.slane %v94_v46, 0  ;;  %v97_v48 = vperm.slane %v94_v46, 1  ;;  %v186_v59 = vld [vmem:[%s860_s4] sm:$0x3]  ;;  %v406_v3 = vld [vmem:[#allocation9] sm:$0xff]  ;;  %s789_s23 = smov [#allocation11]  }
  0x2d   :  { %v189_v60 = vperm.slane %v186_v59, 1  ;;  %v188_v1 = vperm.slane %v186_v59, 0  ;;  %v411_v9 = vunpack.c.h.b16 %v406_v3  ;;  %s452_s24 = sshll.u32 %s789_s23, 4  ;;  %s454_s27 = sshll.u32 %s863_s7, 4  ;;  %vm445_vm1 = vcmask 57344   ;;  %s453_s24 = int_to_ptr.vmem [resolvable:$true] %s452_s24  ;;  %s455_s27 = int_to_ptr.hbm [resolvable:$true] %s454_s27 }
  0x2e   :  { %382 = vmatpush.bf16.msrb.mxu0 %v515_v10  ;;  %357 = vmatpush.bf16.msra.mxu2 %v503_v16  ;;  %v410_v16 = vunpack.c.l.b16 %v406_v3 }
  0x2f   :  { %395 = vmatpush.bf16.msrb.mxu1 %v579_v13  ;;  %370 = vmatpush.bf16.msra.mxu3 %v567_v19  ;;  %v413_v13 = vpack.c.b16 %v411_v9, %v411_v9 }
  0x30   :  { %v412_v18 = vpack.c.b16 %v410_v16, %v410_v16 }
  0x32   :  { %383 = vmatpush.bf16.msrb.mxu0 %v507_v20  ;;  %358 = vmatpush.bf16.msra.mxu2 %v495_v25 }
  0x33   :  { %396 = vmatpush.bf16.msrb.mxu1 %v571_v21  ;;  %371 = vmatpush.bf16.msra.mxu3 %v559_v29  ;;  %v443_v21 = vstv %s862_s6 }
  0x36   :  { %384 = vmatpush.bf16.msrb.mxu0 %v499_v30  ;;  %359 = vmatpush.bf16.msra.mxu2 %v487_v37 }
  0x37   :  { %397 = vmatpush.bf16.msrb.mxu1 %v563_v33  ;;  %372 = vmatpush.bf16.msra.mxu3 %v551_v41 }
  0x3a   :  { %385 = vmatpush.bf16.msrb.mxu0 %v491_v42 }
  0x3b   :  { %398 = vmatpush.bf16.msrb.mxu1 %v555_v45 }
  0x9a   :  { %v133_v49 = vpop.f32.mrf.mxu0 }
  0x9b   :  { %v134_v50 = vadd.f32 %v133_v49, %v96_v47 }
  0x9d   :  { %v146_v51 = vpop.f32.mrf.mxu1  ;;  %v150_v53 = vmax.f32 %v134_v50, 0.0 }
  0x9e   :  { %v147_v52 = vadd.f32 %v146_v51, %v97_v48 }
  0x9f   :  { %v152_v55 = vpack.c.bf16 %v150_v53, %v150_v53 }
  0xa0   :  { %v151_v54 = vmax.f32 %v147_v52, 0.0 }
  0xa1   :  { %360 = vmatmul.bf16.vlgmr.msra.gmra.mxu2 %v152_v55  ;;  %386 = vmatmul.bf16.vlgmr.msrb.gmra.mxu0 %v152_v55 }
  0xa2   :  { %v153_v56 = vpack.c.bf16 %v151_v54, %v151_v54  ;;  %v135_v57 = vpop.f32.mrf.mxu0 }
  0xa4   :  { %373 = vmatmul.bf16.vlgmr.msra.gmra.mxu3 %v153_v56  ;;  %399 = vmatmul.bf16.vlgmr.msrb.gmra.mxu1 %v153_v56 }
  0xa5   :  { %v148_v58 = vpop.f32.mrf.mxu1 }
 0x11e   :  { %v387_v61 = vpop.f32.mrf.mxu0 }
 0x11f   :  { %v388_v62 = vadd.f32 %v387_v61, %v189_v60 }
 0x121   :  { %v400_v63 = vpop.f32.mrf.mxu1 }
 0x122   :  { %v401_v0 = vadd.f32 %v400_v63, %v388_v62 }
 0x124   :  { %v405_v2 = vmax.f32 %v401_v0, 0.0  ;;  %v361_v4 = vpop.f32.mrf.mxu2 }
 0x125   :  { %v362_v5 = vadd.f32 %v361_v4, %v188_v1 }
 0x126   :  { %v408_v7 = vpack.c.bf16 %v405_v2, %v405_v2  ;;  %v389_v8 = vpop.f32.mrf.mxu0 }
 0x127   :  { %v374_v6 = vpop.f32.mrf.mxu3 }
 0x128   :  { %v375_v10 = vadd.f32 %v374_v6, %v362_v5  ;;  %436 = vmatpush.bf16.xpose.msrb.mxu3 %v408_v7 }
 0x129   :  { %v402_v11 = vpop.f32.mrf.mxu1 }
 0x12a   :  { %v404_v12 = vmax.f32 %v375_v10, 0.0 }
 0x12c   :  { %v407_v14 = vpack.c.bf16 %v404_v12, %v404_v12  ;;  %v363_v15 = vpop.f32.mrf.mxu2 }
 0x12e   :  { %423 = vmatpush.bf16.xpose.msrb.mxu2 %v407_v14 }
 0x12f   :  { %v376_v17 = vpop.f32.mrf.mxu3  ;;  %437 = vmatmul.bf16.vlgmr.msrb.gmra.mxu3 %v413_v13 }
 0x135   :  { %424 = vmatmul.bf16.vlgmr.msrb.gmra.mxu2 %v412_v18 }
 0x1b2   :  { %v438_v19 = vpop.f32.mrf.mxu3 }
 0x1b8   :  { %v425_v20 = vpop.f32.mrf.mxu2 }
 0x1b9   :  { %v439_v22 = vadd.f32 %v438_v19, %v425_v20 }
 0x1ba   :  { %v440_v23 = vpop.f32.mrf.mxu3 }
 0x1bb   :  { %v444_v24 = vadd.f32 %v443_v21, %v439_v22 }
 0x1bd   :  { %446 = vst.msk [vmem:[#allocation11] sm:$0x1] %vm445_vm1, %v444_v24 }
 0x1be   :  { %457 = dma.vmem_to_hbm [thread:$0]  %s453_s24, 16, %s455_s27, [#allocation5]  }
 0x1c0   :  { %v427_v25 = vpop.f32.mrf.mxu2 }
 0x1c1   :  { %781 = dma.done.wait [#allocation5], 16  }
 0x1c2   :  { %782 = vsyncadd [#allocation5], 4294967280 }
 0x1c3   :  { %462 = vsyncpa [#allocation4], 1 }
 0x1c4   :  { %463 = vsyncpa [#allocation7], 1 }
 0x1c5   :  { %464 = vsyncpa [#allocation10], 1 }
 0x1c6   :  { %465 = vsyncpa [#allocation5], 1 }

</bundles_post_ra>
